<compile_context>
chip_gen: v7x
topology: tpu7x:2x2x1
jax: 0.10.0
libtpu: 0.0.40
codegen_flags: <defaults>
</compile_context>

<pallas_src>
import math
from functools import lru_cache

import jax
import jax.numpy as jnp
from jax.experimental import pallas as pl
from jax.experimental.pallas import tpu as pltpu

_MiB = 1024 * 1024


def _sum_kernel(*refs):
    """refs = (in_ref_0, ..., in_ref_{n-1}, out_ref). Elementwise sum on VPU.

    Casting to the output dtype happens per-block here (instead of wrapper-side
    whole-array casts that would add un-fusable HBM passes).
    """
    in_refs = refs[:-1]
    out_ref = refs[-1]
    acc_dtype = out_ref.dtype
    acc = in_refs[0][...].astype(acc_dtype) + in_refs[1][...].astype(acc_dtype)
    for r in in_refs[2:]:
        acc = acc + r[...].astype(acc_dtype)
    out_ref[...] = acc


@lru_cache(maxsize=None)
def _vmem_config():
    """Generation-aware VMEM sizing (v5e/v6e: 128 MiB physical, v7x: 64 MiB)."""
    cap = None
    try:
        info_fn = getattr(pltpu, "get_tpu_info", None)
        info = info_fn() if info_fn is not None else None
        if info is not None:
            cap = getattr(info, "vmem_capacity_bytes", None)
            if not cap:
                cap = getattr(info, "vmem_bytes", None)
    except Exception:
        cap = None
    if cap is not None and cap >= 128 * _MiB:
        # v5e / v6e: large double-buffer budget, 4 MiB tiles.
        return {"budget": 56 * _MiB, "max_tile": 4 * _MiB,
                "vmem_limit": 64 * _MiB, "max_inputs": 16}
    # v7x (64 MiB per TensorCore) or unknown: conservative sizing w/ headroom.
    return {"budget": 40 * _MiB, "max_tile": 2 * _MiB,
            "vmem_limit": 56 * _MiB, "max_inputs": 12}


def _cdiv(a, b):
    return -(-a // b)


def _row_quantum(dtypes):
    """Sublane packing quantum: 8 rows (32-bit), 16 (16-bit), 32 (8-bit)."""
    q = 8
    for dt in dtypes:
        it = jnp.dtype(dt).itemsize
        q = max(q, 8 * max(1, 4 // it))
    return q


def _choose_width(n, min_rows):
    """Widest lane-dense W (multiple of 128) dividing n with >= min_rows rows."""
    for w in (4096, 2048, 1024, 512, 256, 128):
        if n % w == 0 and (n // w) >= min_rows:
            return w
    return None


def _choose_tile_rows(rows, target_rows, quantum, prefer_multi):
    """Pick per-block row count.

    Small slabs: one full-extent block (always layout-legal). Non-trivial
    slabs: balanced blocks (rounded up to the packing quantum), with an even
    number of grid steps so both v7x TensorCores get equal work.
    """
    if target_rows >= rows:
        if not prefer_multi or rows < 2 * quantum:
            return rows
        steps = 2
    else:
        t = max(quantum, (target_rows // quantum) * quantum)
        steps = _cdiv(rows, t)
        if prefer_multi and steps < 2:
            steps = 2
    if prefer_multi and steps % 2:
        steps += 1
    tile = _cdiv(rows, steps)
    tile = _cdiv(tile, quantum) * quantum      # round up to packing quantum
    return min(rows, tile)


def _sum_call_slabs(slabs, out_dtype, alias_first, cfg):
    """One pallas_call summing same-shape (rows, W) slabs into out_dtype."""
    rows, W = slabs[0].shape
    dtypes = [x.dtype for x in slabs] + [out_dtype]
    quantum = _row_quantum(dtypes)
    max_itemsize = max(jnp.dtype(dt).itemsize for dt in dtypes)
    n_bufs = len(slabs) + 1  # inputs + output, each double-buffered

    target_tile_bytes = max(128 * 1024,
                            min(cfg["max_tile"], cfg["budget"] // (2 * n_bufs)))
    target_rows = max(quantum, target_tile_bytes // (W * max_itemsize))
    prefer_multi = rows * W * max_itemsize > _MiB
    tile_rows = _choose_tile_rows(rows, target_rows, quantum, prefer_multi)
    grid = (_cdiv(rows, tile_rows),)

    block = pl.BlockSpec((tile_rows, W), lambda i: (i, 0))

    n_elem = rows * W
    in_bytes = sum(int(x.size) * jnp.dtype(x.dtype).itemsize for x in slabs)
    out_bytes = n_elem * jnp.dtype(out_dtype).itemsize
    cost = pl.CostEstimate(
        flops=(len(slabs) - 1) * n_elem,
        transcendentals=0,
        bytes_accessed=in_bytes + out_bytes,
    )

    kwargs = {}
    if alias_first:
        # Running partial sum (input 0) aliases the output HBM buffer.
        kwargs["input_output_aliases"] = {0: 0}

    return pl.pallas_call(
        _sum_kernel,
        out_shape=jax.ShapeDtypeStruct((rows, W), out_dtype),
        grid_spec=pltpu.PrefetchScalarGridSpec(
            num_scalar_prefetch=0,
            grid=grid,
            in_specs=[block] * len(slabs),
            out_specs=block,
        ),
        compiler_params=pltpu.CompilerParams(
            dimension_semantics=("parallel",),
            vmem_limit_bytes=cfg["vmem_limit"],
        ),
        cost_estimate=cost,
        **kwargs,
    )(*slabs)


def _sum_slabs(slabs, out_dtype, cfg):
    """Sum many same-shape slabs, chunking calls to bound the VMEM footprint."""
    max_in = cfg["max_inputs"]
    if len(slabs) <= max_in:
        return _sum_call_slabs(slabs, out_dtype, alias_first=False, cfg=cfg)
    acc = _sum_call_slabs(slabs[:max_in], out_dtype, alias_first=False, cfg=cfg)
    idx = max_in
    step = max_in - 1  # leave slot 0 for the running partial
    while idx < len(slabs):
        chunk = list(slabs[idx:idx + step])
        acc = _sum_call_slabs([acc] + chunk, out_dtype, alias_first=True, cfg=cfg)
        idx += step
    return acc


def pallas_sum(inputs, dtype=None):
    """Elementwise sum of a list of same-shape arrays via a Pallas TPU kernel.

    Mirrors Sum.forward: out = input[0] + input[1] + ...; the `dtype` arg of
    the reference forward is unused there, so it is ignored here too.
    Accumulation happens in jnp.result_type(*input dtypes), matching the
    left-fold `a + b + c` of the reference (bf16 inputs accumulate in bf16).
    """
    inputs = list(inputs)
    assert len(inputs) >= 2, "Sum expects at least two inputs"
    orig_shape = inputs[0].shape
    for x in inputs:
        assert x.shape == orig_shape, "Sum expects same-shape inputs"

    out_dtype = jnp.result_type(*[x.dtype for x in inputs])
    n_elem = int(math.prod(orig_shape))
    quantum = _row_quantum([x.dtype for x in inputs] + [out_dtype])

    n_main = (n_elem // 128) * 128
    if n_main < quantum * 128:
        # Too small for even one packed (quantum x 128) tile: fixed pallas_call
        # overhead would dominate, let XLA fuse the adds instead.
        out = inputs[0] + inputs[1]
        for x in inputs[2:]:
            out = out + x
        return out.astype(out_dtype)

    cfg = _vmem_config()
    tail = n_elem - n_main

    W = _choose_width(n_main, quantum) or 128
    rows = n_main // W

    flats = [jnp.ravel(x) for x in inputs]          # free view for contiguous x
    if tail:
        # TODO(synk): the prefix slice materializes one copy per input for
        # non-128-divisible sizes; the aligned (common) case needs no copies.
        mains = [f[:n_main] for f in flats]
    else:
        mains = flats
    slabs = [m.reshape(rows, W) for m in mains]

    out_slab = _sum_slabs(slabs, out_dtype, cfg)
    out_flat = out_slab.reshape(-1)

    if tail:
        # Ragged tail (< 128 elements): tiny fused XLA add, no padded copies.
        t = flats[0][n_main:] + flats[1][n_main:]
        for f in flats[2:]:
            t = t + f[n_main:]
        out_flat = jnp.concatenate([out_flat, t.astype(out_dtype)])

    return out_flat.reshape(orig_shape)


if __name__ == "__main__":
    key = jax.random.PRNGKey(0)
    keys = jax.random.split(key, 6)

    # Main test: small NCHW feature maps (128-divisible -> zero-copy slab path).
    shape = (2, 4, 16, 16)
    xs = [jax.random.normal(k, shape, dtype=jnp.float32) for k in keys[:3]]
    out = jax.block_until_ready(pallas_sum(xs))
    ref = xs[0] + xs[1] + xs[2]
    assert out.shape == ref.shape
    assert out.dtype == ref.dtype
    assert jnp.allclose(out, ref, atol=1e-6, rtol=1e-6)

    # Ragged test: element count not divisible by 128 (Pallas main + XLA tail).
    shape2 = (5, 250)
    ys = [jax.random.normal(k, shape2, dtype=jnp.float32) for k in keys[3:6]]
    out2 = jax.block_until_ready(pallas_sum(ys))
    ref2 = ys[0] + ys[1] + ys[2]
    assert out2.shape == ref2.shape
    assert out2.dtype == ref2.dtype
    assert jnp.allclose(out2, ref2, atol=1e-6, rtol=1e-6)

    print("KERNEL_OK")
</pallas_src>

<mosaic_0001>
module attributes {stable_mosaic.version = 11 : i64} {
  func.func @_sum_kernel(%arg0: i32, %arg1: memref<8x256xf32, #tpu.memory_space<vmem>>, %arg2: memref<8x256xf32, #tpu.memory_space<vmem>>, %arg3: memref<8x256xf32, #tpu.memory_space<vmem>>, %arg4: memref<8x256xf32, #tpu.memory_space<vmem>>) attributes {dimension_semantics = [#tpu.dimension_semantics<parallel>], iteration_bounds = array<i64: 1>, scalar_prefetch = 0 : i64, scratch_operands = 0 : i64, tpu.core_type = #tpu.core_type<tc>, window_params = [{transform_indices = @transform_0, window_bounds = array<i64: 8, 256>}, {transform_indices = @transform_1, window_bounds = array<i64: 8, 256>}, {transform_indices = @transform_2, window_bounds = array<i64: 8, 256>}, {transform_indices = @transform_3, window_bounds = array<i64: 8, 256>}]} {
    %c0 = arith.constant 0 : index
    %c0_0 = arith.constant 0 : index
    %0 = vector.load %arg1[%c0, %c0_0] : memref<8x256xf32, #tpu.memory_space<vmem>>, vector<8x256xf32>
    %c0_1 = arith.constant 0 : index
    %c0_2 = arith.constant 0 : index
    %1 = vector.load %arg2[%c0_1, %c0_2] : memref<8x256xf32, #tpu.memory_space<vmem>>, vector<8x256xf32>
    %2 = arith.addf %0, %1 : vector<8x256xf32>
    %c0_3 = arith.constant 0 : index
    %c0_4 = arith.constant 0 : index
    %3 = vector.load %arg3[%c0_3, %c0_4] : memref<8x256xf32, #tpu.memory_space<vmem>>, vector<8x256xf32>
    %4 = arith.addf %2, %3 : vector<8x256xf32>
    %c0_5 = arith.constant 0 : index
    %c0_6 = arith.constant 0 : index
    %5 = vector.load %arg4[%c0_5, %c0_6] : memref<8x256xf32, #tpu.memory_space<vmem>>, vector<8x256xf32>
    tpu.vector_store %arg4[%c0_5, %c0_6], %4 {strides = array<i32>} : memref<8x256xf32, #tpu.memory_space<vmem>>, vector<8x256xf32>,
    return
  }
  func.func @transform_0(%arg0: i32) -> (i32, i32) {
    %c0_i32 = arith.constant 0 : i32
    %c0_i32_0 = arith.constant 0 : i32
    return %arg0, %c0_i32 : i32, i32
  }
  func.func @transform_1(%arg0: i32) -> (i32, i32) {
    %c0_i32 = arith.constant 0 : i32
    %c0_i32_0 = arith.constant 0 : i32
    return %arg0, %c0_i32 : i32, i32
  }
  func.func @transform_2(%arg0: i32) -> (i32, i32) {
    %c0_i32 = arith.constant 0 : i32
    %c0_i32_0 = arith.constant 0 : i32
    return %arg0, %c0_i32 : i32, i32
  }
  func.func @transform_3(%arg0: i32) -> (i32, i32) {
    %c0_i32 = arith.constant 0 : i32
    %c0_i32_0 = arith.constant 0 : i32
    return %arg0, %c0_i32 : i32, i32
  }
}

</mosaic_0001>

<bundles_post_ra>
// kernel: tpu_custom_call.1
= control target key start
LH: loop header
LB: loop body
LE: loop exit
PB: predicated region body
PF: predicated region fallthrough
CT: control target
= control target key end

     0   :  { %8 = vsyncpa [#allocation3], 0  ;;  %s248_s0 = inlined_call_operand.hbm [shape: f32[8,256], index: 0, kind: input, shape index: {}]   ;;  %s249_s1 = inlined_call_operand.hbm [shape: f32[8,256], index: 1, kind: input, shape index: {}]   ;;  %s250_s2 = inlined_call_operand.hbm [shape: f32[8,256], index: 2, kind: input, shape index: {}]   ;;  %s251_s3 = inlined_call_operand.hbm [shape: f32[8,256], index: 3, kind: output, shape index: {}]  }
   0x1   :  { %9 = vsyncpa [#allocation6], 0 }
   0x2   :  { %10 = vsyncpa [#allocation4], 0  ;;  %s176_s12 = smov [#allocation5]   ;;  %s177_s14 = smov [#allocation2]  }
   0x3   :  { %s27_s13 = sshll.u32 %s176_s12, 4  ;;  %s17_s15 = sshll.u32 %s177_s14, 4  ;;  %s28_s13 = int_to_ptr.vmem [resolvable:$true] %s27_s13  ;;  %s18_s15 = int_to_ptr.vmem [resolvable:$true] %s17_s15 }
   0x4   :  { %s82_s18 = scalar_lea.hbm %s249_s1, 256 }
   0x5   :  { %p83_p0 = scmp.ne.s32.totalorder %s249_s1, %s82_s18  ;;  %p86_p1 = scmp.lt.u32.totalorder %s82_s18, %s249_s1 }
   0x7   :  { %p88_p2 = pnand %p86_p1, %p83_p0 }
   0x9   :  { %91 = shalt.err (!%p88_p2)
}
   0xa   :  { %s92_s23 = scalar_lea.vmem %s28_s13, 256  ;;  %p97_p4 = scmp.lt.s32.totalorder %s28_s13, %s28_s13 }
   0xb   :  { %p93_p3 = scmp.ne.s32.totalorder %s28_s13, %s92_s23  ;;  %p98_p5 = scmp.lt.s32.totalorder %s92_s23, %s92_s23 }
   0xd   :  { %p99_p6 = por %p98_p5, %p97_p4 }
   0xf   :  { %p100_p7 = pnand %p99_p6, %p93_p3 }
  0x11   :  { %103 = shalt.err (!%p100_p7)
}
  0x12   :  { %30 = dma.hbm_to_vmem [thread:$0]  %s249_s1, 256, %s28_s13, [#allocation6]  }
  0x13   :  { %s104_s28 = scalar_lea.hbm %s248_s0, 256 }
  0x14   :  { %p105_p8 = scmp.ne.s32.totalorder %s248_s0, %s104_s28  ;;  %p108_p9 = scmp.lt.u32.totalorder %s104_s28, %s248_s0 }
  0x16   :  { %p110_p10 = pnand %p108_p9, %p105_p8 }
  0x18   :  { %113 = shalt.err (!%p110_p10)
}
  0x19   :  { %s114_s6 = scalar_lea.vmem %s18_s15, 256  ;;  %p119_p12 = scmp.lt.s32.totalorder %s18_s15, %s18_s15 }
  0x1a   :  { %p115_p11 = scmp.ne.s32.totalorder %s18_s15, %s114_s6  ;;  %p120_p13 = scmp.lt.s32.totalorder %s114_s6, %s114_s6 }
  0x1c   :  { %p121_p0 = por %p120_p13, %p119_p12 }
  0x1e   :  { %p122_p1 = pnand %p121_p0, %p115_p11 }
  0x20   :  { %125 = shalt.err (!%p122_p1)
}
  0x21   :  { %20 = dma.hbm_to_vmem [thread:$0]  %s248_s0, 256, %s18_s15, [#allocation3]  }
  0x22   :  { %s178_s8 = smov [#allocation7]   ;;  %s126_s12 = scalar_lea.hbm %s250_s2, 256 }
  0x23   :  { %s37_s9 = sshll.u32 %s178_s8, 4  ;;  %p127_p2 = scmp.ne.s32.totalorder %s250_s2, %s126_s12  ;;  %s38_s9 = int_to_ptr.vmem [resolvable:$true] %s37_s9 }
  0x24   :  { %p130_p3 = scmp.lt.u32.totalorder %s126_s12, %s250_s2 }
  0x26   :  { %p132_p4 = pnand %p130_p3, %p127_p2 }
  0x28   :  { %135 = shalt.err (!%p132_p4)
}
  0x29   :  { %s136_s18 = scalar_lea.vmem %s38_s9, 256  ;;  %p141_p6 = scmp.lt.s32.totalorder %s38_s9, %s38_s9 }
  0x2a   :  { %p137_p5 = scmp.ne.s32.totalorder %s38_s9, %s136_s18  ;;  %p142_p7 = scmp.lt.s32.totalorder %s136_s18, %s136_s18 }
  0x2c   :  { %p143_p8 = por %p142_p7, %p141_p6 }
  0x2e   :  { %p144_p9 = pnand %p143_p8, %p137_p5 }
  0x30   :  { %147 = shalt.err (!%p144_p9)
}
  0x31   :  { %40 = dma.hbm_to_vmem [thread:$0]  %s250_s2, 256, %s38_s9, [#allocation6]  }
  0x32   :  { %170 = dma.done.wait [#allocation3], 256  }
  0x33   :  { %171 = vsyncadd [#allocation3], 4294967040 }
  0x34   :  { %172 = dma.done.wait [#allocation6], 512  }
  0x35   :  { %173 = vsyncadd [#allocation6], 4294966784  ;;  %v50_v0 = vld [vmem:[#allocation2] sm:$0xff]  ;;  %v52_v1 = vld [vmem:[#allocation5] sm:$0xff]  ;;  %s179_s19 = smov [#allocation8]  }
  0x36   :  { %v56_v2 = vld [vmem:[#allocation7] sm:$0xff]  ;;  %v54_v3 = vadd.f32 %v52_v1, %v50_v0  ;;  %v51_v4 = vld [vmem:[#allocation2 + $0x8] sm:$0xff]  ;;  %v53_v5 = vld [vmem:[#allocation5 + $0x8] sm:$0xff]  ;;  %s68_s20 = sshll.u32 %s179_s19, 4  ;;  %s69_s20 = int_to_ptr.vmem [resolvable:$true] %s68_s20 }
  0x37   :  { %v57_v6 = vld [vmem:[#allocation7 + $0x8] sm:$0xff]  ;;  %v55_v7 = vadd.f32 %v53_v5, %v51_v4  ;;  %s148_s2 = scalar_lea.vmem %s69_s20, 256  ;;  %p153_p11 = scmp.lt.s32.totalorder %s69_s20, %s69_s20 }
  0x38   :  { %v58_v8 = vadd.f32 %v56_v2, %v54_v3  ;;  %p149_p10 = scmp.ne.s32.totalorder %s69_s20, %s148_s2  ;;  %p154_p12 = scmp.lt.s32.totalorder %s148_s2, %s148_s2 }
  0x39   :  { %v59_v9 = vadd.f32 %v57_v6, %v55_v7 }
  0x3a   :  { %60 = vst [vmem:[#allocation8] sm:$0xff] %v58_v8  ;;  %p155_p13 = por %p154_p12, %p153_p11 }
  0x3b   :  { %61 = vst [vmem:[#allocation8 + $0x8] sm:$0xff] %v59_v9 }
  0x3c   :  { %p156_p0 = pnand %p155_p13, %p149_p10 }
  0x3e   :  { %159 = shalt.err (!%p156_p0)
}
  0x3f   :  { %s160_s23 = scalar_lea.hbm %s251_s3, 256 }
  0x40   :  { %p161_p1 = scmp.ne.s32.totalorder %s251_s3, %s160_s23  ;;  %p164_p2 = scmp.lt.u32.totalorder %s160_s23, %s251_s3 }
  0x42   :  { %p166_p3 = pnand %p164_p2, %p161_p1 }
  0x44   :  { %169 = shalt.err (!%p166_p3)
}
  0x45   :  { %71 = dma.vmem_to_hbm [thread:$0]  %s69_s20, 256, %s251_s3, [#allocation4]  }
  0x46   :  { %174 = dma.done.wait [#allocation4], 256  }
  0x47   :  { %175 = vsyncadd [#allocation4], 4294967040 }
  0x48   :  { %75 = vsyncpa [#allocation3], 1 }
  0x49   :  { %76 = vsyncpa [#allocation6], 1 }
  0x4a   :  { %77 = vsyncpa [#allocation4], 1 }

</bundles_post_ra>
